<compile_context>
chip_gen: v7x
topology: tpu7x:2x2x1
jax: 0.10.0
libtpu: 0.0.40
codegen_flags: <defaults>
</compile_context>

<pallas_src>
import functools

import jax
import jax.numpy as jnp
from jax.experimental import pallas as pl
from jax.experimental.pallas import tpu as pltpu

NEG_SLOPE = 0.2  # GATConv default LeakyReLU slope


# ---------------------------------------------------------------------------
# In-kernel helper: masked-softmax attention + aggregation for one head
# ---------------------------------------------------------------------------
def _masked_attention(e, mask, hfeat):
    # e     : [N, N] raw logits   e[i, j] = a_dst.h_i + a_src.h_j
    # mask  : [N, N] bool         True iff edge j -> i (incl. self-loops)
    # hfeat : [N, C] projected features (bias already folded in; attention rows
    #         sum to 1, so the folded bias passes through aggregation unchanged)
    e = jnp.where(e >= 0.0, e, NEG_SLOPE * e)                 # LeakyReLU
    e = jnp.where(mask, e, jnp.float32(-1e30))                # single masking pass
    m = jnp.max(e, axis=-1, keepdims=True)                    # finite (self-loops)
    p = jnp.exp(e - m)                                        # masked entries -> 0
    denom = jnp.sum(p, axis=-1, keepdims=True)                # >= exp(0) = 1: no guard
    attn = p * pl.reciprocal(denom, approx=True)              # EUP, not VPU divide
    return jnp.dot(attn, hfeat, preferred_element_type=jnp.float32)


# ---------------------------------------------------------------------------
# Fused kernel: conv1 (4 heads, concat) -> ReLU -> conv2 (1 head)
# One grid step == one graph of the batch.
# ---------------------------------------------------------------------------
def _ingredient_gnn_kernel(x_ref, adj_ref, w1_ref, w2_ref, out_ref, *, heads, c1):
    # x_ref   : [N, F_in+1]            node features + trailing ones column
    # adj_ref : [N, N]                 adj[i, j] = 1.0 iff edge j -> i
    # w1_ref  : [F_in+1, H*C1 + 2H]    [[W1 | W1@a1_src | W1@a1_dst], [b1 | 0 | 0]]
    # w2_ref  : [H*C1+1, C2 + 2]       [[W2 | W2@a2_src | W2@a2_dst], [b2 | 0 | 0]]
    # out_ref : [N, C2]
    x = x_ref[...]
    mask = adj_ref[...] > 0.0
    h1dim = heads * c1

    # ---- layer 1: one augmented projection feeds h, alpha_src, alpha_dst (MXU) ----
    f1 = jnp.dot(x, w1_ref[...], preferred_element_type=jnp.float32)   # [N, H*C1+2H]
    h1 = f1[:, :h1dim]                                                 # bias folded in
    a_src_t = f1[:, h1dim:h1dim + heads].T                             # [H, N] (hoisted)
    a_dst = f1[:, h1dim + heads:h1dim + 2 * heads]                     # [N, H]

    # TODO(synk): if a bundle dump shows the 4 tiny per-head MXU pushes on the
    # critical path, fuse them into one block-diagonal matmul (measure first).
    head_outs = []
    for h in range(heads):                                    # static unroll (H=4)
        e = a_dst[:, h:h + 1] + a_src_t[h:h + 1, :]           # [N, N]
        head_outs.append(
            _masked_attention(e, mask, h1[:, h * c1:(h + 1) * c1]))
    act = jnp.maximum(jnp.concatenate(head_outs, axis=-1), 0.0)        # ReLU, PyG order

    # ---- layer 2: single head, concat=False (mean over 1 head == identity) --------
    n = act.shape[0]
    act_aug = jnp.concatenate([act, jnp.ones((n, 1), jnp.float32)], axis=-1)
    f2 = jnp.dot(act_aug, w2_ref[...], preferred_element_type=jnp.float32)  # [N, C2+2]
    c2 = f2.shape[1] - 2
    e2 = f2[:, c2 + 1:c2 + 2] + f2[:, c2:c2 + 1].T             # dst_i + src_j
    out_ref[...] = _masked_attention(e2, mask, f2[:, :c2])


# ---------------------------------------------------------------------------
# Glue
# ---------------------------------------------------------------------------
def dense_adj_with_self_loops(edge_index, num_nodes):
    src, dst = edge_index[0], edge_index[1]
    adj = jnp.zeros((num_nodes, num_nodes), jnp.float32)
    adj = adj.at[dst, src].set(1.0)                  # message flows src -> dst
    adj = jnp.maximum(adj, jnp.eye(num_nodes, dtype=jnp.float32))
    return adj


def _augment_weights(params, f_in, out_channels, heads, c1):
    """Fold attention vectors (x @ (W@a) == <h, a>) and biases into the projections."""
    p1, p2 = params["conv1"], params["conv2"]
    h1dim = heads * c1

    w1 = p1["w"]                                              # [F_in, H*C1]
    w1_3 = w1.reshape(f_in, heads, c1)
    a1s = jnp.einsum("fhc,hc->fh", w1_3, p1["att_src"])       # [F_in, H]
    a1d = jnp.einsum("fhc,hc->fh", w1_3, p1["att_dst"])       # [F_in, H]
    top1 = jnp.concatenate([w1, a1s, a1d], axis=1)            # [F_in, H*C1+2H]
    bot1 = jnp.concatenate([p1["bias"].reshape(1, h1dim),
                            jnp.zeros((1, 2 * heads), jnp.float32)], axis=1)
    w1_aug = jnp.concatenate([top1, bot1], axis=0)            # [F_in+1, H*C1+2H]

    w2 = p2["w"]                                              # [H*C1, C2]
    a2s = (w2 @ p2["att_src"][0]).reshape(h1dim, 1)
    a2d = (w2 @ p2["att_dst"][0]).reshape(h1dim, 1)
    top2 = jnp.concatenate([w2, a2s, a2d], axis=1)            # [H*C1, C2+2]
    bot2 = jnp.concatenate([p2["bias"].reshape(1, out_channels),
                            jnp.zeros((1, 2), jnp.float32)], axis=1)
    w2_aug = jnp.concatenate([top2, bot2], axis=0)            # [H*C1+1, C2+2]
    return w1_aug, w2_aug


def ingredient_gnn_forward_batched(x_b, adj_b, params, out_channels, *, heads=4, c1=32):
    """x_b: [B, N, F_in] node features; adj_b: [B, N, N] dense adj with self-loops."""
    b, n, f_in = x_b.shape
    w1_aug, w2_aug = _augment_weights(params, f_in, out_channels, heads, c1)
    x_aug = jnp.concatenate(
        [x_b.astype(jnp.float32), jnp.ones((b, n, 1), jnp.float32)], axis=-1)
    adj_b = adj_b.astype(jnp.float32)

    # Advisory cost estimate (latency-bound micro-kernel).
    h1dim = heads * c1
    flops = b * (2 * n * (f_in + 1) * (h1dim + 2 * heads)    # layer-1 augmented proj
                 + 2 * heads * n * n * c1                    # layer-1 aggregation
                 + 2 * n * (h1dim + 1) * (out_channels + 2)  # layer-2 augmented proj
                 + 2 * n * n * out_channels                  # layer-2 aggregation
                 + (heads + 1) * 8 * n * n)                  # logits / softmax elemwise
    transcendentals = b * (heads + 1) * (n * n + n)          # exp + reciprocal
    bytes_accessed = 4 * (x_aug.size + adj_b.size + w1_aug.size + w2_aug.size
                          + b * n * out_channels)

    # TODO(synk): if N grows beyond a few hundred, row-tile adj/attention over
    # destination nodes (BlockSpec((TILE_N, N), ...)), mark that axis "parallel",
    # and size TILE_N against v7x's 64 MiB physical / 32 MiB default scoped VMEM
    # (raise vmem_limit_bytes if needed) rather than v5e/v6e's 128 MiB.
    return pl.pallas_call(
        functools.partial(_ingredient_gnn_kernel, heads=heads, c1=c1),
        out_shape=jax.ShapeDtypeStruct((b, n, out_channels), jnp.float32),
        grid_spec=pltpu.PrefetchScalarGridSpec(
            num_scalar_prefetch=0,
            grid=(b,),
            in_specs=[
                pl.BlockSpec((None, n, f_in + 1), lambda g: (g, 0, 0)),
                pl.BlockSpec((None, n, n), lambda g: (g, 0, 0)),
                pl.BlockSpec(w1_aug.shape, lambda g: (0, 0)),   # resident across grid
                pl.BlockSpec(w2_aug.shape, lambda g: (0, 0)),   # resident across grid
            ],
            out_specs=pl.BlockSpec((None, n, out_channels), lambda g: (g, 0, 0)),
        ),
        compiler_params=pltpu.CompilerParams(
            dimension_semantics=("parallel",)),   # shards over both TCs on v7x
        cost_estimate=pl.CostEstimate(flops=flops,
                                      transcendentals=transcendentals,
                                      bytes_accessed=bytes_accessed),
    )(x_aug, adj_b, w1_aug, w2_aug)


def ingredient_gnn_forward(x, edge_index, params, out_channels, *, heads=4, c1=32):
    """Original module semantics: one graph per call (B=1 batched path)."""
    adj = dense_adj_with_self_loops(edge_index, x.shape[0])
    return ingredient_gnn_forward_batched(x[None], adj[None], params, out_channels,
                                          heads=heads, c1=c1)[0]


# ---------------------------------------------------------------------------
# Deterministic parameter init (synthetic weights, no checkpoint)
# ---------------------------------------------------------------------------
def init_gat_params(key, f_in, heads, c, concat):
    k1, k2, k3, k4 = jax.random.split(key, 4)
    scale = 1.0 / jnp.sqrt(jnp.float32(f_in))
    return {
        "w": jax.random.normal(k1, (f_in, heads * c), jnp.float32) * scale,
        "att_src": jax.random.normal(k2, (heads, c), jnp.float32) * 0.1,
        "att_dst": jax.random.normal(k3, (heads, c), jnp.float32) * 0.1,
        # Non-zero bias so the folded-bias path is actually exercised.
        "bias": jax.random.normal(k4, (heads * c if concat else c,), jnp.float32) * 0.1,
    }


# ---------------------------------------------------------------------------
# Pure-JAX reference for the correctness check
# ---------------------------------------------------------------------------
def gat_ref(x, adj, params, heads, c, concat, apply_relu):
    h = (x @ params["w"]).reshape(-1, heads, c)
    a_s = jnp.einsum("nhc,hc->nh", h, params["att_src"])
    a_d = jnp.einsum("nhc,hc->nh", h, params["att_dst"])
    e = a_d[:, None, :] + a_s[None, :, :]                 # [N_dst, N_src, H]
    e = jnp.where(e >= 0, e, NEG_SLOPE * e)
    e = jnp.where(adj[:, :, None] > 0, e, -1e30)
    p = jnp.exp(e - e.max(axis=1, keepdims=True)) * adj[:, :, None]
    attn = p / p.sum(axis=1, keepdims=True)
    out = jnp.einsum("ijh,jhc->ihc", attn, h)
    if concat:
        out = out.reshape(-1, heads * c) + params["bias"]
    else:
        out = out.mean(axis=1) + params["bias"]
    return jnp.maximum(out, 0.0) if apply_relu else out


def ingredient_gnn_ref(x, edge_index, params, out_channels):
    adj = dense_adj_with_self_loops(edge_index, x.shape[0])
    h = gat_ref(x, adj, params["conv1"], 4, 32, True, True)
    return gat_ref(h, adj, params["conv2"], 1, out_channels, False, False)


if __name__ == "__main__":
    N = 16            # number of ingredient nodes per graph
    IN_CHANNELS = 8
    OUT_CHANNELS = 16
    B = 2             # graphs in the batch (amortizes launch/DMA fixed cost)

    key = jax.random.PRNGKey(0)
    kx, kp1, kp2 = jax.random.split(key, 3)

    # Batched node features.
    x_b = jax.random.normal(kx, (B, N, IN_CHANNELS), jnp.float32)

    # Two deterministic edge sets ([2, E], row0=src, row1=dst).
    idx = jnp.arange(N, dtype=jnp.int32)
    nxt = (idx + 1) % N
    ring = jnp.stack([jnp.concatenate([idx, nxt]),
                      jnp.concatenate([nxt, idx])], axis=0)        # bidirectional ring
    skip = (idx + 3) % N
    ring_plus = jnp.concatenate([ring, jnp.stack([idx, skip], axis=0)], axis=1)
    edge_sets = [ring, ring_plus]
    adj_b = jnp.stack([dense_adj_with_self_loops(e, N) for e in edge_sets], axis=0)

    params = {
        "conv1": init_gat_params(kp1, IN_CHANNELS, heads=4, c=32, concat=True),
        "conv2": init_gat_params(kp2, 4 * 32, heads=1, c=OUT_CHANNELS, concat=False),
    }

    out = ingredient_gnn_forward_batched(x_b, adj_b, params, OUT_CHANNELS)
    out = jax.block_until_ready(out)
    assert out.shape == (B, N, OUT_CHANNELS)

    # Validate every graph in the batch against the pure-JAX reference.
    # Tolerance slightly looser than exact f32: approx EUP reciprocal in the softmax.
    for g in range(B):
        ref = ingredient_gnn_ref(x_b[g], edge_sets[g], params, OUT_CHANNELS)
        assert jnp.allclose(out[g], ref, atol=5e-3, rtol=5e-3), f"graph {g} mismatch"

    # Single-graph entry point (original module semantics).
    out_single = jax.block_until_ready(
        ingredient_gnn_forward(x_b[0], ring, params, OUT_CHANNELS))
    assert out_single.shape == (N, OUT_CHANNELS)
    assert jnp.allclose(out_single, out[0], atol=1e-5, rtol=1e-5)

    print("KERNEL_OK")
</pallas_src>

<mosaic_0001>
module attributes {stable_mosaic.version = 11 : i64} {
  func.func @_ingredient_gnn_kernel(%arg0: i32, %arg1: memref<1x16x9xf32, #tpu.memory_space<vmem>>, %arg2: memref<1x16x16xf32, #tpu.memory_space<vmem>>, %arg3: memref<9x136xf32, #tpu.memory_space<vmem>>, %arg4: memref<129x18xf32, #tpu.memory_space<vmem>>, %arg5: memref<1x16x16xf32, #tpu.memory_space<vmem>>) attributes {dimension_semantics = [#tpu.dimension_semantics<parallel>], iteration_bounds = array<i64: 2>, scalar_prefetch = 0 : i64, scratch_operands = 0 : i64, tpu.core_type = #tpu.core_type<tc>, window_params = [{transform_indices = @transform_0, window_bounds = array<i64: 1, 16, 9>}, {transform_indices = @transform_1, window_bounds = array<i64: 1, 16, 16>}, {pipeline_mode = #tpu.pipeline_mode<synchronous>, transform_indices = @transform_2, window_bounds = array<i64: 9, 136>}, {pipeline_mode = #tpu.pipeline_mode<synchronous>, transform_indices = @transform_3, window_bounds = array<i64: 129, 18>}, {transform_indices = @transform_4, window_bounds = array<i64: 1, 16, 16>}]} {
    %c0 = arith.constant 0 : index
    %c0_0 = arith.constant 0 : index
    %c0_1 = arith.constant 0 : index
    %0 = vector.load %arg1[%c0, %c0_0, %c0_1] : memref<1x16x9xf32, #tpu.memory_space<vmem>>, vector<1x16x9xf32>
    %1 = vector.shape_cast %0 : vector<1x16x9xf32> to vector<16x9xf32>
    %c0_2 = arith.constant 0 : index
    %c0_3 = arith.constant 0 : index
    %c0_4 = arith.constant 0 : index
    %2 = vector.load %arg2[%c0_2, %c0_3, %c0_4] : memref<1x16x16xf32, #tpu.memory_space<vmem>>, vector<1x16x16xf32>
    %3 = vector.shape_cast %2 : vector<1x16x16xf32> to vector<16x16xf32>
    %cst = arith.constant 0.000000e+00 : f32
    %4 = vector.broadcast %cst : f32 to vector<16x16xf32>
    %5 = arith.cmpf ogt, %3, %4 : vector<16x16xf32>
    %c0_5 = arith.constant 0 : index
    %c0_6 = arith.constant 0 : index
    %6 = vector.load %arg3[%c0_5, %c0_6] : memref<9x136xf32, #tpu.memory_space<vmem>>, vector<9x136xf32>
    %cst_7 = arith.constant dense<0.000000e+00> : vector<16x136xf32>
    %7 = tpu.matmul %1, %6, %cst_7 {dimension_numbers = #tpu.dot_dimension_numbers<[1], [0], [0], [1], [0, 0, 1, 1], [], []>} : vector<16x9xf32>, vector<9x136xf32>, vector<16x136xf32> -> vector<16x136xf32>
    %8 = vector.extract_strided_slice %7 {offsets = [0, 0], sizes = [16, 128], strides = [1, 1]} : vector<16x136xf32> to vector<16x128xf32>
    %9 = vector.extract_strided_slice %7 {offsets = [0, 128], sizes = [16, 4], strides = [1, 1]} : vector<16x136xf32> to vector<16x4xf32>
    %10 = tpu.transpose %9, [1, 0] : vector<16x4xf32> -> vector<4x16xf32>
    %11 = vector.extract_strided_slice %7 {offsets = [0, 132], sizes = [16, 4], strides = [1, 1]} : vector<16x136xf32> to vector<16x4xf32>
    %12 = vector.extract_strided_slice %11 {offsets = [0, 0], sizes = [16, 1], strides = [1, 1]} : vector<16x4xf32> to vector<16x1xf32>
    %13 = vector.extract_strided_slice %10 {offsets = [0, 0], sizes = [1, 16], strides = [1, 1]} : vector<4x16xf32> to vector<1x16xf32>
    %14 = vector.broadcast %12 : vector<16x1xf32> to vector<16x16xf32>
    %15 = vector.broadcast %13 : vector<1x16xf32> to vector<16x16xf32>
    %16 = arith.addf %14, %15 : vector<16x16xf32>
    %17 = vector.extract_strided_slice %8 {offsets = [0, 0], sizes = [16, 32], strides = [1, 1]} : vector<16x128xf32> to vector<16x32xf32>
    %cst_8 = arith.constant 0.000000e+00 : f32
    %18 = vector.broadcast %cst_8 : f32 to vector<16x16xf32>
    %19 = arith.cmpf oge, %16, %18 : vector<16x16xf32>
    %cst_9 = arith.constant 2.000000e-01 : f32
    %20 = vector.broadcast %cst_9 : f32 to vector<16x16xf32>
    %21 = arith.mulf %20, %16 : vector<16x16xf32>
    %22 = arith.select %19, %16, %21 : vector<16x16xi1>, vector<16x16xf32>
    %cst_10 = arith.constant -1.000000e+30 : f32
    %23 = vector.broadcast %cst_10 : f32 to vector<16x16xf32>
    %24 = arith.select %5, %22, %23 : vector<16x16xi1>, vector<16x16xf32>
    %cst_11 = arith.constant dense<0xFF800000> : vector<16xf32>
    %25 = vector.multi_reduction <maximumf>, %24, %cst_11 [1] : vector<16x16xf32> to vector<16xf32>
    %26 = vector.shape_cast %25 : vector<16xf32> to vector<16x1xf32>
    %27 = vector.broadcast %26 : vector<16x1xf32> to vector<16x16xf32>
    %28 = arith.subf %24, %27 : vector<16x16xf32>
    %29 = math.exp %28 : vector<16x16xf32>
    %cst_12 = arith.constant dense<0.000000e+00> : vector<16xf32>
    %30 = vector.multi_reduction <add>, %29, %cst_12 [1] : vector<16x16xf32> to vector<16xf32>
    %31 = vector.shape_cast %30 : vector<16xf32> to vector<16x1xf32>
    %32 = tpu.reciprocal %31 {approx = true} : vector<16x1xf32> -> vector<16x1xf32>
    %33 = vector.broadcast %32 : vector<16x1xf32> to vector<16x16xf32>
    %34 = arith.mulf %29, %33 : vector<16x16xf32>
    %cst_13 = arith.constant dense<0.000000e+00> : vector<16x32xf32>
    %35 = tpu.matmul %34, %17, %cst_13 {dimension_numbers = #tpu.dot_dimension_numbers<[1], [0], [0], [1], [0, 0, 1, 1], [], []>} : vector<16x16xf32>, vector<16x32xf32>, vector<16x32xf32> -> vector<16x32xf32>
    %36 = vector.extract_strided_slice %11 {offsets = [0, 1], sizes = [16, 1], strides = [1, 1]} : vector<16x4xf32> to vector<16x1xf32>
    %37 = vector.extract_strided_slice %10 {offsets = [1, 0], sizes = [1, 16], strides = [1, 1]} : vector<4x16xf32> to vector<1x16xf32>
    %38 = vector.broadcast %36 : vector<16x1xf32> to vector<16x16xf32>
    %39 = vector.broadcast %37 : vector<1x16xf32> to vector<16x16xf32>
    %40 = arith.addf %38, %39 : vector<16x16xf32>
    %41 = vector.extract_strided_slice %8 {offsets = [0, 32], sizes = [16, 32], strides = [1, 1]} : vector<16x128xf32> to vector<16x32xf32>
    %cst_14 = arith.constant 0.000000e+00 : f32
    %42 = vector.broadcast %cst_14 : f32 to vector<16x16xf32>
    %43 = arith.cmpf oge, %40, %42 : vector<16x16xf32>
    %cst_15 = arith.constant 2.000000e-01 : f32
    %44 = vector.broadcast %cst_15 : f32 to vector<16x16xf32>
    %45 = arith.mulf %44, %40 : vector<16x16xf32>
    %46 = arith.select %43, %40, %45 : vector<16x16xi1>, vector<16x16xf32>
    %cst_16 = arith.constant -1.000000e+30 : f32
    %47 = vector.broadcast %cst_16 : f32 to vector<16x16xf32>
    %48 = arith.select %5, %46, %47 : vector<16x16xi1>, vector<16x16xf32>
    %cst_17 = arith.constant dense<0xFF800000> : vector<16xf32>
    %49 = vector.multi_reduction <maximumf>, %48, %cst_17 [1] : vector<16x16xf32> to vector<16xf32>
    %50 = vector.shape_cast %49 : vector<16xf32> to vector<16x1xf32>
    %51 = vector.broadcast %50 : vector<16x1xf32> to vector<16x16xf32>
    %52 = arith.subf %48, %51 : vector<16x16xf32>
    %53 = math.exp %52 : vector<16x16xf32>
    %cst_18 = arith.constant dense<0.000000e+00> : vector<16xf32>
    %54 = vector.multi_reduction <add>, %53, %cst_18 [1] : vector<16x16xf32> to vector<16xf32>
    %55 = vector.shape_cast %54 : vector<16xf32> to vector<16x1xf32>
    %56 = tpu.reciprocal %55 {approx = true} : vector<16x1xf32> -> vector<16x1xf32>
    %57 = vector.broadcast %56 : vector<16x1xf32> to vector<16x16xf32>
    %58 = arith.mulf %53, %57 : vector<16x16xf32>
    %cst_19 = arith.constant dense<0.000000e+00> : vector<16x32xf32>
    %59 = tpu.matmul %58, %41, %cst_19 {dimension_numbers = #tpu.dot_dimension_numbers<[1], [0], [0], [1], [0, 0, 1, 1], [], []>} : vector<16x16xf32>, vector<16x32xf32>, vector<16x32xf32> -> vector<16x32xf32>
    %60 = vector.extract_strided_slice %11 {offsets = [0, 2], sizes = [16, 1], strides = [1, 1]} : vector<16x4xf32> to vector<16x1xf32>
    %61 = vector.extract_strided_slice %10 {offsets = [2, 0], sizes = [1, 16], strides = [1, 1]} : vector<4x16xf32> to vector<1x16xf32>
    %62 = vector.broadcast %60 : vector<16x1xf32> to vector<16x16xf32>
    %63 = vector.broadcast %61 : vector<1x16xf32> to vector<16x16xf32>
    %64 = arith.addf %62, %63 : vector<16x16xf32>
    %65 = vector.extract_strided_slice %8 {offsets = [0, 64], sizes = [16, 32], strides = [1, 1]} : vector<16x128xf32> to vector<16x32xf32>
    %cst_20 = arith.constant 0.000000e+00 : f32
    %66 = vector.broadcast %cst_20 : f32 to vector<16x16xf32>
    %67 = arith.cmpf oge, %64, %66 : vector<16x16xf32>
    %cst_21 = arith.constant 2.000000e-01 : f32
    %68 = vector.broadcast %cst_21 : f32 to vector<16x16xf32>
    %69 = arith.mulf %68, %64 : vector<16x16xf32>
    %70 = arith.select %67, %64, %69 : vector<16x16xi1>, vector<16x16xf32>
    %cst_22 = arith.constant -1.000000e+30 : f32
    %71 = vector.broadcast %cst_22 : f32 to vector<16x16xf32>
    %72 = arith.select %5, %70, %71 : vector<16x16xi1>, vector<16x16xf32>
    %cst_23 = arith.constant dense<0xFF800000> : vector<16xf32>
    %73 = vector.multi_reduction <maximumf>, %72, %cst_23 [1] : vector<16x16xf32> to vector<16xf32>
    %74 = vector.shape_cast %73 : vector<16xf32> to vector<16x1xf32>
    %75 = vector.broadcast %74 : vector<16x1xf32> to vector<16x16xf32>
    %76 = arith.subf %72, %75 : vector<16x16xf32>
    %77 = math.exp %76 : vector<16x16xf32>
    %cst_24 = arith.constant dense<0.000000e+00> : vector<16xf32>
    %78 = vector.multi_reduction <add>, %77, %cst_24 [1] : vector<16x16xf32> to vector<16xf32>
    %79 = vector.shape_cast %78 : vector<16xf32> to vector<16x1xf32>
    %80 = tpu.reciprocal %79 {approx = true} : vector<16x1xf32> -> vector<16x1xf32>
    %81 = vector.broadcast %80 : vector<16x1xf32> to vector<16x16xf32>
    %82 = arith.mulf %77, %81 : vector<16x16xf32>
    %cst_25 = arith.constant dense<0.000000e+00> : vector<16x32xf32>
    %83 = tpu.matmul %82, %65, %cst_25 {dimension_numbers = #tpu.dot_dimension_numbers<[1], [0], [0], [1], [0, 0, 1, 1], [], []>} : vector<16x16xf32>, vector<16x32xf32>, vector<16x32xf32> -> vector<16x32xf32>
    %84 = vector.extract_strided_slice %11 {offsets = [0, 3], sizes = [16, 1], strides = [1, 1]} : vector<16x4xf32> to vector<16x1xf32>
    %85 = vector.extract_strided_slice %10 {offsets = [3, 0], sizes = [1, 16], strides = [1, 1]} : vector<4x16xf32> to vector<1x16xf32>
    %86 = vector.broadcast %84 : vector<16x1xf32> to vector<16x16xf32>
    %87 = vector.broadcast %85 : vector<1x16xf32> to vector<16x16xf32>
    %88 = arith.addf %86, %87 : vector<16x16xf32>
    %89 = vector.extract_strided_slice %8 {offsets = [0, 96], sizes = [16, 32], strides = [1, 1]} : vector<16x128xf32> to vector<16x32xf32>
    %cst_26 = arith.constant 0.000000e+00 : f32
    %90 = vector.broadcast %cst_26 : f32 to vector<16x16xf32>
    %91 = arith.cmpf oge, %88, %90 : vector<16x16xf32>
    %cst_27 = arith.constant 2.000000e-01 : f32
    %92 = vector.broadcast %cst_27 : f32 to vector<16x16xf32>
    %93 = arith.mulf %92, %88 : vector<16x16xf32>
    %94 = arith.select %91, %88, %93 : vector<16x16xi1>, vector<16x16xf32>
    %cst_28 = arith.constant -1.000000e+30 : f32
    %95 = vector.broadcast %cst_28 : f32 to vector<16x16xf32>
    %96 = arith.select %5, %94, %95 : vector<16x16xi1>, vector<16x16xf32>
    %cst_29 = arith.constant dense<0xFF800000> : vector<16xf32>
    %97 = vector.multi_reduction <maximumf>, %96, %cst_29 [1] : vector<16x16xf32> to vector<16xf32>
    %98 = vector.shape_cast %97 : vector<16xf32> to vector<16x1xf32>
    %99 = vector.broadcast %98 : vector<16x1xf32> to vector<16x16xf32>
    %100 = arith.subf %96, %99 : vector<16x16xf32>
    %101 = math.exp %100 : vector<16x16xf32>
    %cst_30 = arith.constant dense<0.000000e+00> : vector<16xf32>
    %102 = vector.multi_reduction <add>, %101, %cst_30 [1] : vector<16x16xf32> to vector<16xf32>
    %103 = vector.shape_cast %102 : vector<16xf32> to vector<16x1xf32>
    %104 = tpu.reciprocal %103 {approx = true} : vector<16x1xf32> -> vector<16x1xf32>
    %105 = vector.broadcast %104 : vector<16x1xf32> to vector<16x16xf32>
    %106 = arith.mulf %101, %105 : vector<16x16xf32>
    %cst_31 = arith.constant dense<0.000000e+00> : vector<16x32xf32>
    %107 = tpu.matmul %106, %89, %cst_31 {dimension_numbers = #tpu.dot_dimension_numbers<[1], [0], [0], [1], [0, 0, 1, 1], [], []>} : vector<16x16xf32>, vector<16x32xf32>, vector<16x32xf32> -> vector<16x32xf32>
    %108 = tpu.concatenate %35, %59, %83, %107 in 1 : vector<16x32xf32>, vector<16x32xf32>, vector<16x32xf32>, vector<16x32xf32> -> vector<16x128xf32>
    %cst_32 = arith.constant 0.000000e+00 : f32
    %109 = vector.broadcast %cst_32 : f32 to vector<16x128xf32>
    %110 = arith.maximumf %108, %109 : vector<16x128xf32>
    %cst_33 = arith.constant 1.000000e+00 : f32
    %111 = vector.broadcast %cst_33 : f32 to vector<16x1xf32>
    %112 = tpu.concatenate %110, %111 in 1 : vector<16x128xf32>, vector<16x1xf32> -> vector<16x129xf32>
    %c0_34 = arith.constant 0 : index
    %c0_35 = arith.constant 0 : index
    %113 = vector.load %arg4[%c0_34, %c0_35] : memref<129x18xf32, #tpu.memory_space<vmem>>, vector<129x18xf32>
    %cst_36 = arith.constant dense<0.000000e+00> : vector<16x18xf32>
    %114 = tpu.matmul %112, %113, %cst_36 {dimension_numbers = #tpu.dot_dimension_numbers<[1], [0], [0], [1], [0, 0, 1, 1], [], []>} : vector<16x129xf32>, vector<129x18xf32>, vector<16x18xf32> -> vector<16x18xf32>
    %115 = vector.extract_strided_slice %114 {offsets = [0, 17], sizes = [16, 1], strides = [1, 1]} : vector<16x18xf32> to vector<16x1xf32>
    %116 = vector.extract_strided_slice %114 {offsets = [0, 16], sizes = [16, 1], strides = [1, 1]} : vector<16x18xf32> to vector<16x1xf32>
    %117 = tpu.transpose %116, [1, 0] : vector<16x1xf32> -> vector<1x16xf32>
    %118 = vector.broadcast %115 : vector<16x1xf32> to vector<16x16xf32>
    %119 = vector.broadcast %117 : vector<1x16xf32> to vector<16x16xf32>
    %120 = arith.addf %118, %119 : vector<16x16xf32>
    %121 = vector.extract_strided_slice %114 {offsets = [0, 0], sizes = [16, 16], strides = [1, 1]} : vector<16x18xf32> to vector<16x16xf32>
    %cst_37 = arith.constant 0.000000e+00 : f32
    %122 = vector.broadcast %cst_37 : f32 to vector<16x16xf32>
    %123 = arith.cmpf oge, %120, %122 : vector<16x16xf32>
    %cst_38 = arith.constant 2.000000e-01 : f32
    %124 = vector.broadcast %cst_38 : f32 to vector<16x16xf32>
    %125 = arith.mulf %124, %120 : vector<16x16xf32>
    %126 = arith.select %123, %120, %125 : vector<16x16xi1>, vector<16x16xf32>
    %cst_39 = arith.constant -1.000000e+30 : f32
    %127 = vector.broadcast %cst_39 : f32 to vector<16x16xf32>
    %128 = arith.select %5, %126, %127 : vector<16x16xi1>, vector<16x16xf32>
    %cst_40 = arith.constant dense<0xFF800000> : vector<16xf32>
    %129 = vector.multi_reduction <maximumf>, %128, %cst_40 [1] : vector<16x16xf32> to vector<16xf32>
    %130 = vector.shape_cast %129 : vector<16xf32> to vector<16x1xf32>
    %131 = vector.broadcast %130 : vector<16x1xf32> to vector<16x16xf32>
    %132 = arith.subf %128, %131 : vector<16x16xf32>
    %133 = math.exp %132 : vector<16x16xf32>
    %cst_41 = arith.constant dense<0.000000e+00> : vector<16xf32>
    %134 = vector.multi_reduction <add>, %133, %cst_41 [1] : vector<16x16xf32> to vector<16xf32>
    %135 = vector.shape_cast %134 : vector<16xf32> to vector<16x1xf32>
    %136 = tpu.reciprocal %135 {approx = true} : vector<16x1xf32> -> vector<16x1xf32>
    %137 = vector.broadcast %136 : vector<16x1xf32> to vector<16x16xf32>
    %138 = arith.mulf %133, %137 : vector<16x16xf32>
    %cst_42 = arith.constant dense<0.000000e+00> : vector<16x16xf32>
    %139 = tpu.matmul %138, %121, %cst_42 {dimension_numbers = #tpu.dot_dimension_numbers<[1], [0], [0], [1], [0, 0, 1, 1], [], []>} : vector<16x16xf32>, vector<16x16xf32>, vector<16x16xf32> -> vector<16x16xf32>
    %c0_43 = arith.constant 0 : index
    %c0_44 = arith.constant 0 : index
    %c0_45 = arith.constant 0 : index
    %140 = vector.load %arg5[%c0_43, %c0_44, %c0_45] : memref<1x16x16xf32, #tpu.memory_space<vmem>>, vector<1x16x16xf32>
    %141 = vector.shape_cast %140 : vector<1x16x16xf32> to vector<16x16xf32>
    %142 = vector.shape_cast %139 : vector<16x16xf32> to vector<1x16x16xf32>
    tpu.vector_store %arg5[%c0_43, %c0_44, %c0_45], %142 {strides = array<i32>} : memref<1x16x16xf32, #tpu.memory_space<vmem>>, vector<1x16x16xf32>,
    return
  }
  func.func @transform_0(%arg0: i32) -> (i32, i32, i32) {
    %c0_i32 = arith.constant 0 : i32
    %c0_i32_0 = arith.constant 0 : i32
    %c0_i32_1 = arith.constant 0 : i32
    return %arg0, %c0_i32, %c0_i32_0 : i32, i32, i32
  }
  func.func @transform_1(%arg0: i32) -> (i32, i32, i32) {
    %c0_i32 = arith.constant 0 : i32
    %c0_i32_0 = arith.constant 0 : i32
    %c0_i32_1 = arith.constant 0 : i32
    return %arg0, %c0_i32, %c0_i32_0 : i32, i32, i32
  }
  func.func @transform_2(%arg0: i32) -> (i32, i32) {
    %c0_i32 = arith.constant 0 : i32
    %c0_i32_0 = arith.constant 0 : i32
    %c0_i32_1 = arith.constant 0 : i32
    return %c0_i32, %c0_i32_0 : i32, i32
  }
  func.func @transform_3(%arg0: i32) -> (i32, i32) {
    %c0_i32 = arith.constant 0 : i32
    %c0_i32_0 = arith.constant 0 : i32
    %c0_i32_1 = arith.constant 0 : i32
    return %c0_i32, %c0_i32_0 : i32, i32
  }
  func.func @transform_4(%arg0: i32) -> (i32, i32, i32) {
    %c0_i32 = arith.constant 0 : i32
    %c0_i32_0 = arith.constant 0 : i32
    %c0_i32_1 = arith.constant 0 : i32
    return %arg0, %c0_i32, %c0_i32_0 : i32, i32, i32
  }
}

</mosaic_0001>

<bundles_post_ra>
// kernel: tpu_custom_call.1
= control target key start
LH: loop header
LB: loop body
LE: loop exit
PB: predicated region body
PF: predicated region fallthrough
CT: control target
= control target key end

     0   :  { %9 = vsyncpa [#allocation3], 0  ;;  %s1900_s0 = inlined_call_operand.vmem [shape: f32[2,16,9], index: 0, kind: input, shape index: {}]   ;;  %s1901_s1 = inlined_call_operand.vmem [shape: f32[2,16,16], index: 1, kind: input, shape index: {}]   ;;  %s1902_s2 = inlined_call_operand.vmem [shape: f32[9,136], index: 2, kind: input, shape index: {}]   ;;  %s1903_s3 = inlined_call_operand.vmem [shape: f32[129,18], index: 3, kind: input, shape index: {}]   ;;  %s1904_s4 = inlined_call_operand.hbm [shape: f32[2,16,16], index: 4, kind: output, shape index: {}]  }
   0x1   :  { %11 = vsyncpa [#allocation3 + $0x1], 0  ;;  %s1623_s15 = smov 0   ;;  %s1625_s16 = smov 0  }
   0x2   :  { %s1627_s17 = smov 0   ;;  %s1629_s18 = smov 0  }
   0x3 LB: > { %s1644_s19 = sadd.s32 4294967295, %s1580_s18   ;;  %s1261_s20 = sadd.s32 4294967294, %s1580_s18   ;;  %s1580_s18 = sphi %s1629_s18, %s1910_s18   ;;  %s1576_s17 = sphi %s1627_s17, %s1909_s17   ;;  %s1572_s16 = sphi %s1625_s16, %s1908_s16   ;;  %s1568_s15 = sphi %s1623_s15, %s1907_s15  }
   0x4   : > { %s1648_s21 = sadd.s32 1, %s1580_s18   ;;  %s118_s22 = sadd.s32 1, %s1576_s17 }
   0x5   : > { %s115_s23 = ssub.s32 %s1580_s18, %s1648_s21  ;;  %p128_p0 = scmp.ne.s32.totalorder %s1576_s17, %s1572_s16 }
   0x6   : > { %p116_p1 = scmp.eq.s32.totalorder %s115_s23, 0  ;;  %p129_p2 = scmp.eq.s32.totalorder %s1644_s19, 1 }
   0x7   : > { %p134_p3 = scmp.ne.s32.totalorder %s1572_s16, %s1568_s15  ;;  %p135_p4 = scmp.eq.s32.totalorder %s1261_s20, 1 }
   0x8   : > { %s1659_s24 = scalar_select %p116_p1, %s1576_s17, %s118_s22  }
   0x9   : > { %p1661_p5 = por %p129_p2, %p128_p0  ;;  %p1665_p6 = por %p135_p4, %p134_p3 }
   0xa   : > { %p1264_p7 = scmp.ge.s32.totalorder %s1580_s18, 1  ;;  %p175_p8 = scmp.lt.s32.totalorder %s1580_s18, 3 }
   0xc   : > { %p176_p9 = pnand %p1264_p7, %p175_p8 }
   0xd   : > { %v223_v0 = vld [vmem:[%s1902_s2 + $0x8] sm:$0xff] (!%p176_p9)  ;;  %v225_v1 = vld [vmem:[%s1902_s2 + $0x18] sm:$0x1] (!%p176_p9)  ;;  %vm233_vm0 = vcmask (!%p176_p9), 1040384   ;;  %v222_v2 = vld [vmem:[%s1902_s2] sm:$0xff] (!%p176_p9)  ;;  %vm1582_vm1 = vmmov (!%p176_p9), 1   ;;  %v359_v21 = vlaneseq (!%p176_p9) }
   0xe   : > { %179 = sbr.rel (%p176_p9) target bundleno = 2119 (0x847), region = 36  ;;  %v1350_v3 = vpack.c.bf16 (!%p176_p9), %v225_v1, %v223_v0  ;;  %vm1351_vm2 = vmpackc.low (!%p176_p9), %vm233_vm0, %vm1582_vm1  ;;  %v224_v4 = vld [vmem:[%s1902_s2 + $0x10] sm:$0x1] (!%p176_p9)  ;;  %p206_p10 = scmp.lt.s32.totalorder (!%p176_p9), %s1644_s19, 1  ;;  %v1583_v6 = vmov (!%p176_p9), 0.0   ;;  %vm226_vm3 = vcmask (!%p176_p9), 72704  }
   0xf   : > { %v1353_v5 = vpack.c.bf16 (!%p176_p9), %v224_v4, %v222_v2  ;;  %304 = vmatprep.mubr.f32.mxu1 (!%p176_p9), %v1583_v6  ;;  %v1584_v9 = vmov (!%p176_p9), 5   ;;  %v1585_v10 = vmov (!%p176_p9), 4   ;;  %v1586_v17 = vmov (!%p176_p9), 7   ;;  %s1588_s23 = smov (!%p176_p9), 96   ;;  %s1589_s27 = smov (!%p176_p9), 32  }
  0x10   : > { %1352 = vmatprep.subr.msk.bf16.mxu1 (!%p176_p9), %vm1351_vm2, %v1350_v3  ;;  %1455 = vset.pattern.permute.xlu1 (!%p176_p9), %v1584_v9  ;;  %v1587_v18 = vmov (!%p176_p9), 6   ;;  %v1698_v23 = vshrl.u32 (!%p176_p9), %v359_v21, 7  ;;  %vm373_vm8 = vcmask (!%p176_p9), 130048   ;;  %s1590_s28 = smov (!%p176_p9), 64   ;;  %vm924_vm15 = vcmask (!%p176_p9), 7168   ;;  %s1294_s11 = sshll.u32 (!%p176_p9), %s1644_s19, 8 }
  0x11   : > { %1355 = vmatpush1.bf16.msk.msra.mxu1 (!%p176_p9), %vm1351_vm2, %v1353_v5  ;;  %1454 = vset.pattern.permute.xlu0 (!%p176_p9), %v1585_v10  ;;  %vm896_vm1 = vcmask (!%p176_p9), 261120   ;;  %vm899_vm2 = vcmask (!%p176_p9), 523264   ;;  %s1855_s14 = scalar_lea.hbm (!%p176_p9), %s1904_s4, %s1294_s11 }
  0x12   : > { %v361_v26 = vsub.s32 (!%p176_p9), 0, %v1698_v23  ;;  %v487_v27 = vsub.s32 (!%p176_p9), 1, %v1698_v23  ;;  %v620_v28 = vsub.s32 (!%p176_p9), 2, %v1698_v23  ;;  %v751_v35 = vsub.s32 (!%p176_p9), 3, %v1698_v23 }
  0x15   : > { %s1687_s9 = scalar_select %p206_p10, %s1644_s19, 1 }
  0x16   : > { %s1595_s19 = smov [#allocation2]  }
  0x17   : > { %s1292_s10 = sshll.u32 %s1687_s9, 4  ;;  %s1522_s29 = sshll.u32 %s1595_s19, 4  ;;  %s1523_s29 = int_to_ptr.vmem [resolvable:$false] %s1522_s29 }
  0x18   : > { %s210_s13 = scalar_lea.vmem %s1900_s0, %s1292_s10  ;;  %s215_s22 = scalar_lea.vmem %s1901_s1, %s1292_s10 }
  0x19   : > { %v216_v7 = vld [vmem:[%s210_s13] sm:$0xff]  ;;  %v217_v8 = vld [vmem:[%s210_s13 + $0x8] sm:$0xff]  ;;  %s1524_s30 = scalar_lea.vmem %s1523_s29, 512 }
  0x1a   : > { %1272 = vmatmul.mubr.msk.f32.vlgmr.msra.gmra.mrb[0].mxu1 %vm226_vm3, %v216_v7  ;;  %v1708_v31 = vld [vmem:[%s215_s22] sm:$0xff]  ;;  %v1710_v32 = vld [vmem:[%s215_s22 + $0x8] sm:$0xff] }
  0x1b   : > { %310 = vmatprep.mubr.f32.mxu1 %v1583_v6  ;;  %vm221_vm4 = vcmp.gt.f32.partialorder %v1710_v32, 0.0  ;;  %vm220_vm5 = vcmp.gt.f32.partialorder %v1708_v31, 0.0 }
  0x1e   : > { %1273 = vmatmul.mubr.msk.f32.gmra.mrb[2].mxu1 %vm226_vm3, %v217_v8  ;;  %vm902_vm3 = vcmask 785408  }
  0xed   : > { %v306_v11 = vpop.f32.mrb[0].mxu1 }
  0xee   : > { %v308_v12 = vpop.f32.mrb[1].mxu1 }
  0xef   : > { %478 = vperm.xlu1 %1455, %v308_v12   ;;  %351 = vperm.xlu0 %1454, %v308_v12  }
  0xf1   : > { %v312_v13 = vpop.f32.mrb[2].mxu1 }
  0xf2   : > { %v314_v14 = vpop.f32.mrb[3].mxu1  ;;  %v1356_v15 = vpack.c.bf16 %v312_v13, %v306_v11  ;;  %v1696_v16 = vpack.i.bf16 %v312_v13, %v306_v11 }
  0xf3   : > { %1457 = vset.pattern.permute.xlu1 %v1586_v17  ;;  %356 = vperm.xlu0 %1454, %v314_v14  }
  0xf4   : > { %742 = vperm.xlu1 %1457, %v308_v12   ;;  %1357 = vmatprep.subr.bf16.mxu1 %v1356_v15 }
  0xf5   : > { %1359 = vmatpush3.bf16.msra.mxu1 %v1356_v15 }
  0xf7   : > { %1456 = vset.pattern.permute.xlu0 %v1587_v18 }
  0xf8   : > { %1458 = vset.pattern.permute.xlu1 %v1584_v9  ;;  %611 = vperm.xlu0 %1456, %v308_v12  }
  0xf9   : > { %482 = vperm.xlu1 %1458, %v314_v14  }
  0xfc   : > { %1460 = vset.pattern.permute.xlu0 %v1586_v17 }
  0xfd   : > { %1459 = vset.pattern.permute.xlu1 %v1587_v18  ;;  %746 = vperm.xlu0 %1460, %v314_v14  }
  0xfe   : > { %615 = vperm.xlu1 %1459, %v314_v14  }
 0x127   : > { %317 = vxpose.xlu1.b32.start [1/2] (short) (narrow) %v308_v12, 8 }
 0x12b   : > { %318 = vxpose.xlu1.b32.end [2/2] (short) (narrow) %v314_v14, 8 }
 0x16e   : > { %v479_v19 = vpop.permute.xlu1 %478  ;;  %v352_v24 = vpop.permute.xlu0 %351 }
 0x172   : > { %v357_v29 = vpop.permute.xlu0 %356 }
 0x173   : > { %v743_v20 = vpop.permute.xlu1 %742 }
 0x177   : > { %v612_v43 = vpop.permute.xlu0 %611 }
 0x178   : > { %v483_v22 = vpop.permute.xlu1 %482 }
 0x17c   : > { %v747_v1 = vpop.permute.xlu0 %746 }
 0x17d   : > { %v616_v25 = vpop.permute.xlu1 %615 }
 0x1a7   : > { %v333_v30 = vpop.trf.xlu1 }
 0x1a8   : > { %v362_v33 = vrot.slane %v333_v30, %v361_v26  ;;  %v488_v34 = vrot.slane %v333_v30, %v487_v27  ;;  %v621_v36 = vrot.slane %v333_v30, %v620_v28  ;;  %v752_v44 = vrot.slane %v333_v30, %v751_v35 }
 0x1aa   : > { %v490_v37 = vadd.f32 %v488_v34, %v483_v22  ;;  %v363_v38 = vadd.f32 %v362_v33, %v352_v24  ;;  %v489_v39 = vadd.f32 %v488_v34, %v479_v19  ;;  %v364_v40 = vadd.f32 %v362_v33, %v357_v29 }
 0x1ab   : > { %v622_v49 = vadd.f32 %v621_v36, %v612_v43  ;;  %v753_v58 = vadd.f32 %v752_v44, %v743_v20  ;;  %v623_v63 = vadd.f32 %v621_v36, %v616_v25  ;;  %v754_v5 = vadd.f32 %v752_v44, %v747_v1 }
 0x1ac   : > { %vm492_vm6 = vcmp.ge.f32.partialorder %v490_v37, 0.0  ;;  %v494_v41 = vmul.f32 0.2, %v490_v37  ;;  %vm365_vm7 = vcmp.ge.f32.partialorder %v363_v38, 0.0  ;;  %v367_v42 = vmul.f32 0.2, %v363_v38 }
 0x1ad   : > { %vm491_vm9 = vcmp.ge.f32.partialorder %v489_v39, 0.0  ;;  %v493_v45 = vmul.f32 0.2, %v489_v39  ;;  %v368_v48 = vmul.f32 0.2, %v364_v40  ;;  %vm366_vm10 = vcmp.ge.f32.partialorder %v364_v40, 0.0 }
 0x1ae   : > { %v496_v46 = vsel %vm492_vm6, %v490_v37, %v494_v41  ;;  %v369_v47 = vsel %vm365_vm7, %v363_v38, %v367_v42  ;;  %v626_v57 = vmul.f32 0.2, %v622_v49  ;;  %vm624_vm11 = vcmp.ge.f32.partialorder %v622_v49, 0.0 }
 0x1af   : > { %v1719_v50 = vsel %vm221_vm4, %v496_v46, -1e+30  ;;  %v371_v51 = vsel %vm220_vm5, %v369_v47, -1e+30  ;;  %v495_v52 = vsel %vm491_vm9, %v489_v39, %v493_v45  ;;  %v370_v56 = vsel %vm366_vm10, %v364_v40, %v368_v48 }
 0x1b0   : > { %v502_v53 = vsel %vm373_vm8, %v1719_v50, -inf  ;;  %v374_v54 = vsel %vm373_vm8, %v371_v51, -inf  ;;  %v497_v55 = vsel %vm220_vm5, %v495_v52, -1e+30  ;;  %v372_v60 = vsel %vm221_vm4, %v370_v56, -1e+30 }
 0x1b1   : > { %503 = vmax.xlane.f32.xlu1 %v502_v53  ;;  %375 = vmax.xlane.f32.xlu0 %v374_v54  ;;  %v499_v59 = vsel %vm373_vm8, %v497_v55, -inf  ;;  %v628_v61 = vsel %vm624_vm11, %v622_v49, %v626_v57  ;;  %v757_v62 = vmul.f32 0.2, %v753_v58  ;;  %vm755_vm12 = vcmp.ge.f32.partialorder %v753_v58, 0.0 }
 0x1b2   : > { %v377_v0 = vsel %vm373_vm8, %v372_v60, -inf  ;;  %v630_v2 = vsel %vm220_vm5, %v628_v61, -1e+30  ;;  %v627_v4 = vmul.f32 0.2, %v623_v63  ;;  %vm625_vm13 = vcmp.ge.f32.partialorder %v623_v63, 0.0 }
 0x1b3   : > { %v759_v3 = vsel %vm755_vm12, %v753_v58, %v757_v62  ;;  %v632_v7 = vsel %vm373_vm8, %v630_v2, -inf  ;;  %v758_v10 = vmul.f32 0.2, %v754_v5  ;;  %vm756_vm14 = vcmp.ge.f32.partialorder %v754_v5, 0.0 }
 0x1b4   : > { %v761_v8 = vsel %vm220_vm5, %v759_v3, -1e+30  ;;  %v629_v9 = vsel %vm625_vm13, %v623_v63, %v627_v4 }
 0x1b5   : > { %500 = vmax.xlane.f32.xlu0 %v499_v59  ;;  %v763_v11 = vsel %vm373_vm8, %v761_v8, -inf  ;;  %v631_v12 = vsel %vm221_vm4, %v629_v9, -1e+30  ;;  %v760_v13 = vsel %vm756_vm14, %v754_v5, %v758_v10 }
 0x1b6   : > { %v635_v14 = vsel %vm373_vm8, %v631_v12, -inf  ;;  %v762_v15 = vsel %vm221_vm4, %v760_v13, -1e+30 }
 0x1b7   : > { %v766_v17 = vsel %vm373_vm8, %v762_v15, -inf }
 0x1b9   : > { %378 = vmax.xlane.f32.xlu0 %v377_v0 }
 0x1bd   : > { %633 = vmax.xlane.f32.xlu0 %v632_v7 }
 0x1c1   : > { %764 = vmax.xlane.f32.xlu0 %v763_v11 }
 0x1c2   : > { %1462 = vrot.lane.b32.xlu1 %v1696_v16, %s1588_s23 }
 0x1c5   : > { %636 = vmax.xlane.f32.xlu0 %v635_v14 }
 0x1c9   : > { %767 = vmax.xlane.f32.xlu0 %v766_v17 }
 0x23e   : > { %v504_v18 = vpop.xlane.xlu1 %503  ;;  %v376_v19 = vpop.xlane.xlu0 %375 }
 0x23f   : > { %v380_v20 = vsub.f32 %v371_v51, %v376_v19  ;;  %v506_v37 = vsub.f32 %v1719_v50, %v504_v18 }
 0x241   : > { %v382_v21 = vmul.f32 1.442695, %v380_v20  ;;  %v509_v45 = vmul.f32 1.442695, %v506_v37 }
 0x242   : > { %v1463_v22 = vpop.permute.xlu1 %1462  ;;  %v501_v24 = vpop.xlane.xlu0 %500 }
 0x243   : > { %v1465_v25 = vunpack.i.h.bf16 %v1463_v22  ;;  %v1464_v27 = vunpack.i.l.bf16 %v1463_v22  ;;  %v505_v28 = vsub.f32 %v497_v55, %v501_v24  ;;  %1478 = vpow2.f32 %v382_v21 }
 0x245   : > { %v1746_v29 = vpack.c.bf16 %v1465_v25, %v1464_v27  ;;  %v507_v30 = vmul.f32 1.442695, %v505_v28 }
 0x246   : > { %v379_v33 = vpop.xlane.xlu0 %378 }
 0x247   : > { %1480 = vpow2.f32 %v507_v30  ;;  %1361 = vmatprep.subr.bf16.mxu1 %v1746_v29  ;;  %v381_v34 = vsub.f32 %v372_v60, %v379_v33 }
 0x249   : > { %v384_v38 = vmul.f32 1.442695, %v381_v34 }
 0x24a   : > { %v634_v35 = vpop.xlane.xlu0 %633 }
 0x24b   : > { %v638_v36 = vsub.f32 %v630_v2, %v634_v35 }
 0x24d   : > { %v640_v39 = vmul.f32 1.442695, %v638_v36  ;;  %v1479_v40 = vpop.eup %1478 }
 0x24e   : > { %v765_v41 = vpop.xlane.xlu0 %764  ;;  %v386_v43 = vsel %vm373_vm8, %v1479_v40, 0.0 }
 0x24f   : > { %1482 = vpow2.f32 %v640_v39  ;;  %v769_v42 = vsub.f32 %v761_v8, %v765_v41  ;;  %387 = vadd.xlane.f32.xlu0 %v386_v43  ;;  %v907_v39 = vld [vmem:[%s1903_s3] sm:$0xff]  ;;  %v909_v41 = vld [vmem:[%s1903_s3 + $0x10] sm:$0xff] }
 0x250   : > { %1484 = vpow2.f32 %v384_v38 }
 0x251   : > { %v1481_v44 = vpop.eup %1480  ;;  %v771_v46 = vmul.f32 1.442695, %v769_v42  ;;  %v1591_v42 = vmov 0.0|0.0  }
 0x252   : > { %v637_v47 = vpop.xlane.xlu0 %636  ;;  %v511_v48 = vsel %vm373_vm8, %v1481_v44, 0.0  ;;  %1372 = vmatprep.subr.bf16.mxu0 %v1591_v42 }
 0x253   : > { %1486 = vpow2.f32 %v771_v46  ;;  %v639_v49 = vsub.f32 %v631_v12, %v637_v47  ;;  %512 = vadd.xlane.f32.xlu0 %v511_v48  ;;  %v911_v46 = vld [vmem:[%s1903_s3 + $0x20] sm:$0xff]  ;;  %v912_v47 = vld [vmem:[%s1903_s3 + $0x28] sm:$0xff] }
 0x254   : > { %1488 = vpow2.f32 %v509_v45  ;;  %v1379_v48 = vpack.c.bf16 %v912_v47, %v911_v46 }
 0x255   : > { %v642_v50 = vmul.f32 1.442695, %v639_v49  ;;  %v913_v49 = vld [vmem:[%s1903_s3 + $0x30] sm:$0xff] }
 0x256   : > { %v768_v51 = vpop.xlane.xlu0 %767 }
 0x257   : > { %v770_v52 = vsub.f32 %v762_v15, %v768_v51  ;;  %1490 = vpow2.f32 %v642_v50  ;;  %v914_v50 = vld [vmem:[%s1903_s3 + $0x38] sm:$0xff] }
 0x258   : > { %v1382_v51 = vpack.c.bf16 %v914_v50, %v913_v49 }
 0x259   : > { %v1483_v53 = vpop.eup %1482  ;;  %v773_v54 = vmul.f32 1.442695, %v770_v52  ;;  %v915_v52 = vld [vmem:[%s1903_s3 + $0x40] sm:$0xff] }
 0x25a   : > { %v644_v55 = vsel %vm373_vm8, %v1483_v53, 0.0  ;;  %v1485_v56 = vpop.eup %1484 }
 0x25b   : > { %645 = vadd.xlane.f32.xlu0 %v644_v55  ;;  %1492 = vpow2.f32 %v773_v54  ;;  %v389_v58 = vsel %vm373_vm8, %v1485_v56, 0.0  ;;  %v917_v55 = vld [vmem:[%s1903_s3 + $0x50] sm:$0xff] }
 0x25d   : > { %v1753_v57 = vpop.eup %1486 }
 0x25e   : > { %v775_v59 = vsel %vm373_vm8, %v1753_v57, 0.0  ;;  %v1489_v60 = vpop.eup %1488 }
 0x25f   : > { %390 = vadd.xlane.f32.xlu0 %v389_v58  ;;  %776 = vadd.xlane.f32.xlu1 %v775_v59  ;;  %v514_v61 = vsel %vm373_vm8, %v1489_v60, 0.0  ;;  %v920_v59 = vld [vmem:[%s1903_s3 + $0x68] sm:$0xff] }
 0x261   : > { %v1491_v62 = vpop.eup %1490 }
 0x262   : > { %v647_v63 = vsel %vm373_vm8, %v1491_v62, 0.0 }
 0x263   : > { %515 = vadd.xlane.f32.xlu0 %v514_v61  ;;  %v921_v61 = vld [vmem:[%s1903_s3 + $0x70] sm:$0xff] }
 0x265   : > { %v1493_v0 = vpop.eup %1492 }
 0x266   : > { %v778_v1 = vsel %vm373_vm8, %v1493_v0, 0.0 }
 0x267   : > { %648 = vadd.xlane.f32.xlu0 %v647_v63 }
 0x26b   : > { %779 = vadd.xlane.f32.xlu0 %v778_v1 }
 0x270   : > { %1472 = vrot.lane.b32.xlu1 %v1696_v16, %s1589_s27 }
 0x281   : > { %1467 = vrot.lane.b32.xlu0 %v1696_v16, %s1590_s28 }
 0x2dc   : > { %v388_v2 = vpop.xlane.xlu0 %387 }
 0x2dd   : > { %1494 = vrcp.f32 %v388_v2 }
 0x2e0   : > { %v513_v3 = vpop.xlane.xlu0 %512 }
 0x2e1   : > { %1496 = vrcp.f32 %v513_v3 }
 0x2e7   : > { %v1495_v4 = vpop.eup %1494 }
 0x2e8   : > { %v646_v5 = vpop.xlane.xlu0 %645  ;;  %v394_v7 = vmul.f32 %v1495_v4, %v1479_v40  ;;  %v908_v40 = vld [vmem:[%s1903_s3 + $0x8] sm:$0xff]  ;;  %v923_v4 = vld [vmem:[%s1903_s3 + $0x80] sm:$0x1] }
 0x2e9   : > { %v1373_v43 = vpack.c.bf16 %v908_v40, %v907_v39 }
 0x2ea   : > { %1319 = vmatprep.mubr.msk.f32.mxu1 %vm373_vm8, %v394_v7 }
 0x2eb   : > { %v1497_v12 = vpop.eup %1496  ;;  %1374 = vmatpush1.bf16.msra.mxu0 %v1373_v43 }
 0x2ec   : > { %v391_v8 = vpop.xlane.xlu0 %390  ;;  %v777_v10 = vpop.xlane.xlu1 %776  ;;  %v519_v18 = vmul.f32 %v1497_v12, %v1481_v44  ;;  %v910_v44 = vld [vmem:[%s1903_s3 + $0x18] sm:$0xff]  ;;  %1375 = vmatprep.subr.bf16.mxu0 %v1591_v42 }
 0x2ed   : > { %1498 = vrcp.f32 %v391_v8  ;;  %v1376_v45 = vpack.c.bf16 %v910_v44, %v909_v41 }
 0x2ee   : > { %1500 = vrcp.f32 %v646_v5  ;;  %v1592_v5 = vmov 1.0  }
 0x2ef   : > { %1377 = vmatpush1.bf16.msra.mxu0 %v1376_v45  ;;  %1283 = vmatprep.mubr.msk.f32.mxu0 %vm924_vm15, %v1592_v5 }
 0x2f0   : > { %v516_v9 = vpop.xlane.xlu0 %515  ;;  %v1473_v17 = vpop.permute.xlu1 %1472  ;;  %1378 = vmatprep.subr.bf16.mxu0 %v1591_v42 }
 0x2f1   : > { %1502 = vrcp.f32 %v516_v9  ;;  %v1475_v22 = vunpack.i.h.bf16 %v1473_v17  ;;  %v1474_v24 = vunpack.i.l.bf16 %v1473_v17 }
 0x2f3   : > { %v1368_v35 = vpack.c.bf16 %v1475_v22, %v1474_v24  ;;  %1380 = vmatpush1.bf16.msra.mxu0 %v1379_v48 }
 0x2f4   : > { %v649_v11 = vpop.xlane.xlu0 %648  ;;  %1381 = vmatprep.subr.bf16.mxu0 %v1591_v42 }
 0x2f5   : > { %1504 = vrcp.f32 %v649_v11 }
 0x2f6   : > { %1506 = vrcp.f32 %v777_v10 }
 0x2f7   : > { %v1499_v16 = vpop.eup %1498  ;;  %1383 = vmatpush1.bf16.msra.mxu0 %v1382_v51 }
 0x2f8   : > { %v780_v13 = vpop.xlane.xlu0 %779  ;;  %v395_v14 = vmul.f32 %v1499_v16, %v1485_v56  ;;  %v1501_v15 = vpop.eup %1500  ;;  %1384 = vmatprep.subr.bf16.mxu0 %v1591_v42  ;;  %v918_v56 = vld [vmem:[%s1903_s3 + $0x58] sm:$0xff] }
 0x2f9   : > { %1508 = vrcp.f32 %v780_v13  ;;  %v652_v28 = vmul.f32 %v1501_v15, %v1483_v53  ;;  %v916_v53 = vld [vmem:[%s1903_s3 + $0x48] sm:$0xff]  ;;  %v1388_v58 = vpack.c.bf16 %v918_v56, %v917_v55 }
 0x2fa   : > { %1320 = vmatmul.mubr.msk.f32.vlgmr.msra.gmra.mrb[4].mxu1 %vm373_vm8, %v395_v14  ;;  %v1385_v54 = vpack.c.bf16 %v916_v53, %v915_v52 }
 0x2fb   : > { %v1503_v19 = vpop.eup %1502  ;;  %1363 = vmatpush3.bf16.msra.mxu1 %v1746_v29  ;;  %1326 = vmatprep.mubr.msk.f32.mxu1 %vm373_vm8, %v519_v18 }
 0x2fc   : > { %v520_v20 = vmul.f32 %v1503_v19, %v1489_v60  ;;  %v1468_v21 = vpop.permute.xlu0 %1467  ;;  %1386 = vmatpush1.bf16.msra.mxu0 %v1385_v54 }
 0x2fd   : > { %v1470_v25 = vunpack.i.h.bf16 %v1468_v21  ;;  %v1469_v27 = vunpack.i.l.bf16 %v1468_v21  ;;  %1387 = vmatprep.subr.bf16.mxu0 %v1591_v42 }
 0x2fe   : > { %1327 = vmatmul.mubr.msk.f32.vlgmr.msra.gmra.mrb[6].mxu1 %vm373_vm8, %v520_v20 }
 0x2ff   : > { %v1364_v30 = vpack.c.bf16 %v1470_v25, %v1469_v27  ;;  %v1505_v33 = vpop.eup %1504  ;;  %1333 = vmatprep.mubr.msk.f32.mxu1 %vm373_vm8, %v652_v28  ;;  %v1593_v25 = vmov 17  }
 0x300   : > { %v1507_v34 = vpop.eup %1506  ;;  %v653_v36 = vmul.f32 %v1505_v33, %v1491_v62  ;;  %1389 = vmatpush1.bf16.msra.mxu0 %v1388_v58  ;;  %v922_v62 = vld [vmem:[%s1903_s3 + $0x78] sm:$0xff]  ;;  %1476 = vset.pattern.permute.xlu1 %v1593_v25 }
 0x301   : > { %1365 = vmatprep.subr.bf16.mxu1 %v1364_v30  ;;  %v783_v37 = vmul.f32 %v1507_v34, %v1753_v57  ;;  %v919_v57 = vld [vmem:[%s1903_s3 + $0x60] sm:$0xff]  ;;  %1390 = vmatprep.subr.bf16.mxu0 %v1591_v42 }
 0x302   : > { %1367 = vmatpush3.bf16.msra.mxu1 %v1364_v30  ;;  %v1391_v60 = vpack.c.bf16 %v920_v59, %v919_v57  ;;  %1477 = vset.pattern.permute.xlu0 %v1593_v25 }
 0x303   : > { %1369 = vmatprep.subr.bf16.mxu1 %v1368_v35  ;;  %v1509_v29 = vpop.eup %1508 }
 0x304   : > { %v784_v38 = vmul.f32 %v1509_v29, %v1493_v0  ;;  %1392 = vmatpush1.bf16.msra.mxu0 %v1391_v60  ;;  %v1394_v0 = vpack.c.bf16 %v922_v62, %v921_v61 }
 0x305   : > { %1334 = vmatmul.mubr.msk.f32.vlgmr.msra.gmra.mrb[8].mxu1 %vm373_vm8, %v653_v36  ;;  %1393 = vmatprep.subr.bf16.mxu0 %v1591_v42 }
 0x306   : > { %1371 = vmatpush3.bf16.msra.mxu1 %v1368_v35  ;;  %1340 = vmatprep.mubr.msk.f32.mxu1 %vm373_vm8, %v783_v37 }
 0x308   : > { %1395 = vmatpush1.bf16.msra.mxu0 %v1394_v0 }
 0x309   : > { %1341 = vmatmul.mubr.msk.f32.vlgmr.msra.gmra.mrb[10].mxu1 %vm373_vm8, %v784_v38  ;;  %963 = vmatprep.subr.mxu0 %v1583_v6 }
 0x30c   : > { %1282 = vmatpush1.msk.msra.mxu0 %vm233_vm0, %v923_v4 }
 0x3cd   : > { %v1321_v63 = vpop.f32.mrb[4].mxu1 }
 0x3ce   : > { %v468_v1 = vpop.f32.mrb[5].mxu1 }
 0x3d1   : > { %v1328_v2 = vpop.f32.mrb[6].mxu1 }
 0x3d2   : > { %v601_v3 = vpop.f32.mrb[7].mxu1 }
 0x3d3   : > { %874 = vrot.lane.b32.xlu1 %v601_v3, %s1589_s27 }
 0x3d8   : > { %v1335_v7 = vpop.f32.mrb[8].mxu1 }
 0x3d9   : > { %v732_v8 = vpop.f32.mrb[9].mxu1 }
 0x3da   : > { %882 = vrot.lane.b32.xlu0 %v732_v8, %s1590_s28 }
 0x3dc   : > { %v1342_v9 = vpop.f32.mrb[10].mxu1 }
 0x3dd   : > { %v863_v10 = vpop.f32.mrb[11].mxu1 }
 0x3de   : > { %876 = vrot.lane.b32.xlu0 %v1328_v2, %s1589_s27  ;;  %890 = vrot.lane.b32.xlu1 %v863_v10, %s1588_s23  ;;  %s203_s27 = sand.u32 1, %s1572_s16  }
 0x3df   : > { %s1859_s20 = scalar_lea.sflag [#allocation3], %s203_s27 }
 0x3e2   : > { %892 = vrot.lane.b32.xlu0 %v1342_v9, %s1588_s23  ;;  %884 = vrot.lane.b32.xlu1 %v1335_v7, %s1590_s28  ;;  %s1594_s23 = smov 112   ;;  %s1265_s28 = sshll.u32 %s203_s27, 4 }
 0x3e3   : > { %s205_s9 = scalar_lea.vmem [#allocation2], %s1265_s28 }
 0x3e4   : > { %s1187_s10 = sshll.u32 %s205_s9, 4  ;;  %s1850_s10 = int_to_ptr.vmem [resolvable:$true] %s1187_s10 }
 0x3e5   : > { %s1518_s22 = scalar_lea.vmem %s1850_s10, 256  ;;  %p1525_p0 = scmp.lt.s32.totalorder %s1850_s10, %s1523_s29 }
 0x3e6   : > { %p1519_p11 = scmp.ne.s32.totalorder %s1850_s10, %s1518_s22  ;;  %p1526_p1 = scmp.lt.s32.totalorder %s1524_s30, %s1518_s22 }
 0x3e8   : > { %p1520_p12 = pnand %p1519_p11, %p1661_p5  ;;  %p1527_p2 = por %p1526_p1, %p1525_p0 }
 0x3ea   : > { %p1521_p13 = pneg %p1520_p12 }
 0x3ec   : > { %p1528_p3 = pnand %p1527_p2, %p1521_p13 }
 0x445   : > { %v875_v6 = vpop.permute.xlu1 %874 }
 0x446   : > { %v897_v12 = vsel %vm896_vm1, %v468_v1, %v875_v6 }
 0x44c   : > { %v883_v11 = vpop.permute.xlu0 %882 }
 0x44d   : > { %v900_v16 = vsel %vm899_vm2, %v897_v12, %v883_v11 }
 0x450   : > { %v877_v13 = vpop.permute.xlu0 %876  ;;  %v891_v14 = vpop.permute.xlu1 %890 }
 0x451   : > { %v903_v15 = vsel %vm902_vm3, %v900_v16, %v891_v14  ;;  %v898_v18 = vsel %vm896_vm1, %v1321_v63, %v877_v13 }
 0x452   : > { %v905_v17 = vmax.f32 %v903_v15, 0.0 }
 0x454   : > { %v893_v19 = vpop.permute.xlu0 %892  ;;  %996 = vmatmul.mubr.f32.vlgmr.msra.gmra.mrb[0].mxu0 %v905_v17  ;;  %v885_v20 = vpop.permute.xlu1 %884 }
 0x455   : > { %v901_v21 = vsel %vm899_vm2, %v898_v18, %v885_v20  ;;  %1284 = vmatprep.mubr.msk.f32.mxu0 %vm924_vm15, %v1592_v5 }
 0x456   : > { %v904_v22 = vsel %vm902_vm3, %v901_v21, %v893_v19 }
 0x457   : > { %v906_v24 = vmax.f32 %v904_v22, 0.0 }
 0x459   : > { %1001 = vmatmul.mubr.f32.gmra.mrb[2].mxu0 %v906_v24 }
 0x527   : > { %v997_v27 = vpop.f32.mrb[0].mxu0 }
 0x528   : > { %1008 = vrot.lane.b32.xlu1 %v997_v27, %s1594_s23  ;;  %v999_v28 = vpop.f32.mrb[1].mxu0 }
 0x52c   : > { %1047 = vperm.xlu1 %1476, %v997_v27   ;;  %v1002_v30 = vpop.f32.mrb[2].mxu0 }
 0x52d   : > { %v1396_v33 = vpack.c.bf16 %v1002_v30, %v997_v27  ;;  %1010 = vrot.lane.b32.xlu0 %v1002_v30, %s1594_s23  ;;  %v1004_v34 = vpop.f32.mrb[3].mxu0 }
 0x52f   : > { %1397 = vmatprep.subr.bf16.mxu1 %v1396_v33 }
 0x530   : > { %1399 = vmatpush3.bf16.msra.mxu1 %v1396_v33 }
 0x531   : > { %1051 = vperm.xlu0 %1477, %v1002_v30  }
 0x59a   : > { %v1009_v35 = vpop.permute.xlu1 %1008 }
 0x59b   : > { %1014 = vxpose.xlu1.b32.start [1/2] (short) (narrow) %v1009_v35, 8 }
 0x59f   : > { %v1011_v36 = vpop.permute.xlu0 %1010 }
 0x5a0   : > { %1015 = vxpose.xlu1.b32.end [2/2] (short) (narrow) %v1011_v36, 8 }
 0x5ab   : > { %v1048_v29 = vpop.permute.xlu1 %1047 }
 0x5b0   : > { %v1052_v39 = vpop.permute.xlu0 %1051 }
 0x61c   : > { %v1030_v37 = vpop.trf.xlu1 }
 0x61d   : > { %v1057_v38 = vrot.slane %v1030_v37, %v361_v26 }
 0x61f   : > { %v1058_v40 = vadd.f32 %v1057_v38, %v1048_v29  ;;  %v1059_v41 = vadd.f32 %v1057_v38, %v1052_v39 }
 0x621   : > { %vm1060_vm0 = vcmp.ge.f32.partialorder %v1058_v40, 0.0  ;;  %v1062_v42 = vmul.f32 0.2, %v1058_v40  ;;  %vm1061_vm6 = vcmp.ge.f32.partialorder %v1059_v41, 0.0  ;;  %v1063_v43 = vmul.f32 0.2, %v1059_v41 }
 0x623   : > { %v1064_v44 = vsel %vm1060_vm0, %v1058_v40, %v1062_v42  ;;  %v1065_v45 = vsel %vm1061_vm6, %v1059_v41, %v1063_v43 }
 0x624   : > { %v1066_v46 = vsel %vm220_vm5, %v1064_v44, -1e+30  ;;  %v1067_v48 = vsel %vm221_vm4, %v1065_v45, -1e+30 }
 0x625   : > { %v1068_v47 = vsel %vm373_vm8, %v1066_v46, -inf  ;;  %v1071_v23 = vsel %vm373_vm8, %v1067_v48, -inf }
 0x626   : > { %1069 = vmax.xlane.f32.xlu0 %v1068_v47 }
 0x62a   : > { %1072 = vmax.xlane.f32.xlu0 %v1071_v23 }
 0x6b3   : > { %v1070_v26 = vpop.xlane.xlu0 %1069 }
 0x6b4   : > { %v1074_v49 = vsub.f32 %v1066_v46, %v1070_v26 }
 0x6b6   : > { %v1076_v50 = vmul.f32 1.442695, %v1074_v49 }
 0x6b7   : > { %v1073_v51 = vpop.xlane.xlu0 %1072 }
 0x6b8   : > { %1510 = vpow2.f32 %v1076_v50  ;;  %v1075_v52 = vsub.f32 %v1067_v48, %v1073_v51 }
 0x6ba   : > { %v1078_v53 = vmul.f32 1.442695, %v1075_v52 }
 0x6bc   : > { %1512 = vpow2.f32 %v1078_v53 }
 0x6c2   : > { %v1511_v54 = vpop.eup %1510 }
 0x6c3   : > { %v1080_v31 = vsel %vm373_vm8, %v1511_v54, 0.0 }
 0x6c4   : > { %1081 = vadd.xlane.f32.xlu0 %v1080_v31 }
 0x6c6   : > { %v1513_v55 = vpop.eup %1512 }
 0x6c7   : > { %v1083_v32 = vsel %vm373_vm8, %v1513_v55, 0.0 }
 0x6c8   : > { %1084 = vadd.xlane.f32.xlu1 %v1083_v32 }
 0x751   : > { %v1082_v56 = vpop.xlane.xlu0 %1081 }
 0x752   : > { %1514 = vrcp.f32 %v1082_v56 }
 0x755   : > { %v1085_v57 = vpop.xlane.xlu1 %1084 }
 0x756   : > { %1516 = vrcp.f32 %v1085_v57 }
 0x75c   : > { %v1515_v58 = vpop.eup %1514 }
 0x75d   : > { %v1088_v59 = vmul.f32 %v1515_v58, %v1511_v54 }
 0x75f   : > { %1347 = vmatprep.mubr.msk.f32.mxu1 %vm373_vm8, %v1088_v59 }
 0x760   : > { %v1517_v60 = vpop.eup %1516 }
 0x761   : > { %v1089_v61 = vmul.f32 %v1517_v60, %v1513_v55 }
 0x763   : > { %1348 = vmatmul.mubr.msk.f32.vlgmr.msra.gmra.mrb[12].mxu1 %vm373_vm8, %v1089_v61 }
 0x836   : > { %v1349_v62 = vpop.f32.mrb[12].mxu1 }
 0x837   : > { %1172 = vst.msk [vmem:[%s205_s9 + $0x8] sm:$0xff] %vm373_vm8, %v1349_v62  ;;  %v1162_v63 = vpop.f32.mrb[13].mxu1 }
 0x838   : > { %1171 = vst.msk [vmem:[%s205_s9] sm:$0xff] %vm373_vm8, %v1162_v63 }
 0x839   : > { %1531 = shalt.err (!%p1528_p3)
}
 0x83a   : > { %s1532_s5 = scalar_lea.hbm %s1855_s14, 256  ;;  %s1536_s8 = scalar_lea.hbm %s1904_s4, 512 }
 0x83b   : > { %p1533_p4 = scmp.ne.s32.totalorder %s1855_s14, %s1532_s5  ;;  %p1537_p9 = scmp.lt.u32.totalorder %s1855_s14, %s1904_s4 }
 0x83c   : > { %p1538_p10 = scmp.lt.u32.totalorder %s1536_s8, %s1532_s5  ;;  %p1540_p12 = scmp.lt.u32.totalorder %s1532_s5, %s1855_s14 }
 0x83d   : > { %p1534_p7 = pnand %p1533_p4, %p1661_p5 }
 0x83e   : > { %p1539_p11 = por %p1538_p10, %p1537_p9 }
 0x83f   : > { %p1535_p8 = pneg %p1534_p7 }
 0x840   : > { %p1541_p13 = por %p1540_p12, %p1539_p11 }
 0x842   : > { %p1542_p0 = pnand %p1541_p13, %p1535_p8 }
 0x844   : > { %1545 = shalt.err (!%p1542_p0)
}
 0x845   : > { %s1596_s28 = smov 128   ;;  %s1597_s9 = smov 8  }
 0x846   : > { %1400 = dma.vmem_to_hbm [thread:$0]  (%p1661_p5), %s1850_s10, 256, %s1855_s14, %s1859_s20, %s1596_s28, %s1596_s28, %s1597_s9  }
 0x847 PF: > { %p1406_p1 = scmp.ge.s32.totalorder %s1580_s18, 2  ;;  %s1202_s11 = sand.u32 1, %s1568_s15  }
 0x848   : > { %s1203_s12 = scalar_lea.sflag [#allocation3], %s1202_s11 }
 0x849   : > { %p1403_p2 = pnand %p1406_p1, %p1665_p6 }
 0x84b   : > { %1563 = dma.done.wait (!%p1403_p2), %s1203_s12, 256  }
 0x84c   : > { %1565 = vsyncadd (!%p1403_p2), %s1203_s12, 4294967040  ;;  %p14_p3 = scmp.ge.s32.totalorder %s1648_s21, 4   ;;  %s1907_s15 = smov %s1572_s16 }
 0x84d   : > { %s1908_s16 = smov %s1576_s17  ;;  %s1909_s17 = smov %s1659_s24 }
 0x84e   : > { %s1910_s18 = smov %s1648_s21  ;;  %16 = sbr.rel (!%p14_p3) target bundleno = 3 (0x3), region = 74 }
 0x855   :  { %1208 = vsyncpa [#allocation3], 1 }
 0x856   :  { %1210 = vsyncpa [#allocation3 + $0x1], 1 }

</bundles_post_ra>
